<compile_context>
chip_gen: v7x
topology: tpu7x:2x2x1
jax: 0.10.0
libtpu: 0.0.40
codegen_flags: <defaults>
</compile_context>

<pallas_src>
import functools

import jax
import jax.numpy as jnp
from jax.experimental import pallas as pl
from jax.experimental.pallas import tpu as pltpu

BN_EPS = 1e-3          # module uses eps=0.001 explicitly
N_BN_LAYERS = 4
LANE = 128


def _round_up(x, m):
    return ((x + m - 1) // m) * m


def decoder_kernel(x_ref, w_ref, vec_ref, o_ref):
    """x_ref: (B, L); w_ref: (5, L, L); vec_ref: (16, L); o_ref: (B, L).

    vec rows: [0:4]  = gamma for BN layers 1..4
              [4:8]  = beta  for BN layers 1..4
              [8]    = bias of the final Linear
              [9:16] = zero padding (sublane alignment)
    """
    h = x_ref[...].astype(jnp.float32)
    vec = vec_ref[...].astype(jnp.float32)

    for l in range(N_BN_LAYERS):
        # Linear (bias omitted: cancelled by training-mode BN mean subtraction)
        h = jnp.dot(h, w_ref[l], preferred_element_type=jnp.float32)

        # Training-mode BatchNorm1d over the batch axis (biased variance),
        # fused one-pass statistics.
        mean = jnp.mean(h, axis=0, keepdims=True)
        msq = jnp.mean(h * h, axis=0, keepdims=True)
        var = msq - mean * mean
        inv = jax.lax.rsqrt(var + BN_EPS)

        gamma = vec[l:l + 1, :]
        beta = vec[N_BN_LAYERS + l:N_BN_LAYERS + l + 1, :]
        h = (h - mean) * (inv * gamma) + beta

        # ReLU
        h = jnp.maximum(h, 0.0)

    # Final Linear (with bias).
    out = jnp.dot(h, w_ref[N_BN_LAYERS], preferred_element_type=jnp.float32)
    out = out + vec[2 * N_BN_LAYERS:2 * N_BN_LAYERS + 1, :]
    o_ref[...] = out.astype(o_ref.dtype)


def pack_decoder_params(params, latent_dim, fc_units, input_dim):
    """Pack (pre-transposed) PyTorch-style params into two lane-dense arrays.

    params layout (as produced by init_decoder_params):
      w1, b1, g1, be1, w2, b2, g2, be2, w3, b3, g3, be3, w4, b4, g4, be4, w5, b5
    where wN is (in, out), bN / gN / beN are (1, out).
    Biases b1..b4 are discarded (no-ops before training-mode BN).
    """
    (w1, _b1, g1, be1,
     w2, _b2, g2, be2,
     w3, _b3, g3, be3,
     w4, _b4, g4, be4,
     w5, b5) = params

    lane = _round_up(max(latent_dim, fc_units, input_dim), LANE)

    ws = [w1, w2, w3, w4, w5]
    w_stack = jnp.zeros((5, lane, lane), jnp.float32)
    for l, w in enumerate(ws):
        din, dout = w.shape
        w_stack = w_stack.at[l, :din, :dout].set(w.astype(jnp.float32))

    vec = jnp.zeros((16, lane), jnp.float32)
    for l, (g, be) in enumerate([(g1, be1), (g2, be2), (g3, be3), (g4, be4)]):
        vec = vec.at[l, :g.shape[-1]].set(g.reshape(-1).astype(jnp.float32))
        vec = vec.at[N_BN_LAYERS + l, :be.shape[-1]].set(
            be.reshape(-1).astype(jnp.float32))
    vec = vec.at[2 * N_BN_LAYERS, :b5.shape[-1]].set(
        b5.reshape(-1).astype(jnp.float32))

    return w_stack, vec


@functools.partial(jax.jit, static_argnames=("input_dim", "latent_dim"))
def decoder_forward(x, w_stack, vec, input_dim, latent_dim):
    """x: (B, latent_dim) fp32.  Returns (B, input_dim) fp32."""
    B = x.shape[0]
    lane = w_stack.shape[-1]

    # Lane-dense padded input; padded columns are zero and remain zero through
    # the network (zero weights / gamma / beta / bias in padded positions).
    x_pad = jnp.zeros((B, lane), jnp.float32).at[:, :latent_dim].set(
        x.astype(jnp.float32))

    out_pad = pl.pallas_call(
        decoder_kernel,
        out_shape=jax.ShapeDtypeStruct((B, lane), jnp.float32),
        in_specs=[
            pl.BlockSpec(memory_space=pltpu.VMEM),  # x
            pl.BlockSpec(memory_space=pltpu.VMEM),  # packed weights
            pl.BlockSpec(memory_space=pltpu.VMEM),  # packed gamma/beta/b5
        ],
        out_specs=pl.BlockSpec(memory_space=pltpu.VMEM),
    )(x_pad, w_stack, vec)

    return out_pad[:, :input_dim]


def init_decoder_params(key, input_dim, fc_units, latent_dim):
    """Deterministic init. Linear weights are (in, out); BN gamma=1, beta=0."""
    dims = [(latent_dim, fc_units),
            (fc_units, fc_units),
            (fc_units, fc_units),
            (fc_units, fc_units),
            (fc_units, input_dim)]
    params = []
    for li, (din, dout) in enumerate(dims):
        key, kw, kb = jax.random.split(key, 3)
        bound = 1.0 / jnp.sqrt(jnp.float32(din))
        w = jax.random.uniform(kw, (din, dout), jnp.float32, -bound, bound)
        b = jax.random.uniform(kb, (1, dout), jnp.float32, -bound, bound)
        params += [w, b]
        if li < 4:  # BN after first 4 linears
            gamma = jnp.ones((1, dout), jnp.float32)
            beta = jnp.zeros((1, dout), jnp.float32)
            params += [gamma, beta]
    return tuple(params)


def reference_forward(x, params, input_dim):
    """Plain-JAX reference mirroring the PyTorch module (training-mode BN,
    biases b1..b4 included — they cancel mathematically)."""
    (w1, b1, g1, be1,
     w2, b2, g2, be2,
     w3, b3, g3, be3,
     w4, b4, g4, be4,
     w5, b5) = params

    def bn_relu(h, g, be):
        m = h.mean(0, keepdims=True)
        v = ((h - m) ** 2).mean(0, keepdims=True)
        return jnp.maximum((h - m) / jnp.sqrt(v + BN_EPS) * g + be, 0.0)

    h = bn_relu(x @ w1 + b1, g1, be1)
    h = bn_relu(h @ w2 + b2, g2, be2)
    h = bn_relu(h @ w3 + b3, g3, be3)
    h = bn_relu(h @ w4 + b4, g4, be4)
    return h @ w5 + b5


if __name__ == "__main__":
    # Small shapes consistent with the module's forward: x is (batch, latent_dim).
    batch = 8
    latent_dim = 8
    fc_units = 32
    input_dim = 16

    key = jax.random.PRNGKey(0)
    key, kx = jax.random.split(key)
    x = jax.random.normal(kx, (batch, latent_dim), jnp.float32)

    params = init_decoder_params(key, input_dim, fc_units, latent_dim)
    w_stack, vec = pack_decoder_params(params, latent_dim, fc_units, input_dim)

    out = decoder_forward(x, w_stack, vec, input_dim, latent_dim)
    out = jax.block_until_ready(out)

    ref = reference_forward(x, params, input_dim)
    assert out.shape == (batch, input_dim)
    assert jnp.allclose(out, ref, atol=1e-4, rtol=1e-4), "mismatch vs JAX reference"

    print("KERNEL_OK")
</pallas_src>

<mosaic_0001>
module attributes {stable_mosaic.version = 11 : i64} {
  func.func @decoder_kernel(%arg0: memref<8x128xf32, #tpu.memory_space<vmem>>, %arg1: memref<5x128x128xf32, #tpu.memory_space<vmem>>, %arg2: memref<16x128xf32, #tpu.memory_space<vmem>>, %arg3: memref<8x128xf32, #tpu.memory_space<vmem>>) attributes {dimension_semantics = [], scalar_prefetch = 0 : i64, scratch_operands = 0 : i64, tpu.core_type = #tpu.core_type<tc>} {
    %c0 = arith.constant 0 : index
    %c0_0 = arith.constant 0 : index
    %0 = vector.load %arg0[%c0, %c0_0] : memref<8x128xf32, #tpu.memory_space<vmem>>, vector<8x128xf32>
    %c0_1 = arith.constant 0 : index
    %c0_2 = arith.constant 0 : index
    %1 = vector.load %arg2[%c0_1, %c0_2] : memref<16x128xf32, #tpu.memory_space<vmem>>, vector<16x128xf32>
    %c0_3 = arith.constant 0 : index
    %c0_4 = arith.constant 0 : index
    %c0_5 = arith.constant 0 : index
    %2 = vector.load %arg1[%c0_3, %c0_4, %c0_5] : memref<5x128x128xf32, #tpu.memory_space<vmem>>, vector<1x128x128xf32>
    %3 = vector.shape_cast %2 : vector<1x128x128xf32> to vector<128x128xf32>
    %cst = arith.constant dense<0.000000e+00> : vector<8x128xf32>
    %4 = tpu.matmul %0, %3, %cst {dimension_numbers = #tpu.dot_dimension_numbers<[1], [0], [0], [1], [0, 0, 1, 1], [], []>} : vector<8x128xf32>, vector<128x128xf32>, vector<8x128xf32> -> vector<8x128xf32>
    %cst_6 = arith.constant dense<0.000000e+00> : vector<128xf32>
    %5 = vector.multi_reduction <add>, %4, %cst_6 [0] : vector<8x128xf32> to vector<128xf32>
    %6 = vector.shape_cast %5 : vector<128xf32> to vector<1x128xf32>
    %cst_7 = arith.constant 8.000000e+00 : f32
    %7 = vector.broadcast %cst_7 : f32 to vector<1x128xf32>
    %8 = arith.divf %6, %7 : vector<1x128xf32>
    %9 = arith.mulf %4, %4 : vector<8x128xf32>
    %cst_8 = arith.constant dense<0.000000e+00> : vector<128xf32>
    %10 = vector.multi_reduction <add>, %9, %cst_8 [0] : vector<8x128xf32> to vector<128xf32>
    %11 = vector.shape_cast %10 : vector<128xf32> to vector<1x128xf32>
    %cst_9 = arith.constant 8.000000e+00 : f32
    %12 = vector.broadcast %cst_9 : f32 to vector<1x128xf32>
    %13 = arith.divf %11, %12 : vector<1x128xf32>
    %14 = arith.mulf %8, %8 : vector<1x128xf32>
    %15 = arith.subf %13, %14 : vector<1x128xf32>
    %cst_10 = arith.constant 1.000000e-03 : f32
    %16 = vector.broadcast %cst_10 : f32 to vector<1x128xf32>
    %17 = arith.addf %15, %16 : vector<1x128xf32>
    %18 = math.rsqrt %17 : vector<1x128xf32>
    %19 = vector.extract_strided_slice %1 {offsets = [0, 0], sizes = [1, 128], strides = [1, 1]} : vector<16x128xf32> to vector<1x128xf32>
    %20 = vector.extract_strided_slice %1 {offsets = [4, 0], sizes = [1, 128], strides = [1, 1]} : vector<16x128xf32> to vector<1x128xf32>
    %21 = vector.broadcast %8 : vector<1x128xf32> to vector<8x128xf32>
    %22 = arith.subf %4, %21 : vector<8x128xf32>
    %23 = arith.mulf %18, %19 : vector<1x128xf32>
    %24 = vector.broadcast %23 : vector<1x128xf32> to vector<8x128xf32>
    %25 = arith.mulf %22, %24 : vector<8x128xf32>
    %26 = vector.broadcast %20 : vector<1x128xf32> to vector<8x128xf32>
    %27 = arith.addf %25, %26 : vector<8x128xf32>
    %cst_11 = arith.constant 0.000000e+00 : f32
    %28 = vector.broadcast %cst_11 : f32 to vector<8x128xf32>
    %29 = arith.maximumf %27, %28 : vector<8x128xf32>
    %c1 = arith.constant 1 : index
    %c0_12 = arith.constant 0 : index
    %c0_13 = arith.constant 0 : index
    %30 = vector.load %arg1[%c1, %c0_12, %c0_13] : memref<5x128x128xf32, #tpu.memory_space<vmem>>, vector<1x128x128xf32>
    %31 = vector.shape_cast %30 : vector<1x128x128xf32> to vector<128x128xf32>
    %cst_14 = arith.constant dense<0.000000e+00> : vector<8x128xf32>
    %32 = tpu.matmul %29, %31, %cst_14 {dimension_numbers = #tpu.dot_dimension_numbers<[1], [0], [0], [1], [0, 0, 1, 1], [], []>} : vector<8x128xf32>, vector<128x128xf32>, vector<8x128xf32> -> vector<8x128xf32>
    %cst_15 = arith.constant dense<0.000000e+00> : vector<128xf32>
    %33 = vector.multi_reduction <add>, %32, %cst_15 [0] : vector<8x128xf32> to vector<128xf32>
    %34 = vector.shape_cast %33 : vector<128xf32> to vector<1x128xf32>
    %cst_16 = arith.constant 8.000000e+00 : f32
    %35 = vector.broadcast %cst_16 : f32 to vector<1x128xf32>
    %36 = arith.divf %34, %35 : vector<1x128xf32>
    %37 = arith.mulf %32, %32 : vector<8x128xf32>
    %cst_17 = arith.constant dense<0.000000e+00> : vector<128xf32>
    %38 = vector.multi_reduction <add>, %37, %cst_17 [0] : vector<8x128xf32> to vector<128xf32>
    %39 = vector.shape_cast %38 : vector<128xf32> to vector<1x128xf32>
    %cst_18 = arith.constant 8.000000e+00 : f32
    %40 = vector.broadcast %cst_18 : f32 to vector<1x128xf32>
    %41 = arith.divf %39, %40 : vector<1x128xf32>
    %42 = arith.mulf %36, %36 : vector<1x128xf32>
    %43 = arith.subf %41, %42 : vector<1x128xf32>
    %cst_19 = arith.constant 1.000000e-03 : f32
    %44 = vector.broadcast %cst_19 : f32 to vector<1x128xf32>
    %45 = arith.addf %43, %44 : vector<1x128xf32>
    %46 = math.rsqrt %45 : vector<1x128xf32>
    %47 = vector.extract_strided_slice %1 {offsets = [1, 0], sizes = [1, 128], strides = [1, 1]} : vector<16x128xf32> to vector<1x128xf32>
    %48 = vector.extract_strided_slice %1 {offsets = [5, 0], sizes = [1, 128], strides = [1, 1]} : vector<16x128xf32> to vector<1x128xf32>
    %49 = vector.broadcast %36 : vector<1x128xf32> to vector<8x128xf32>
    %50 = arith.subf %32, %49 : vector<8x128xf32>
    %51 = arith.mulf %46, %47 : vector<1x128xf32>
    %52 = vector.broadcast %51 : vector<1x128xf32> to vector<8x128xf32>
    %53 = arith.mulf %50, %52 : vector<8x128xf32>
    %54 = vector.broadcast %48 : vector<1x128xf32> to vector<8x128xf32>
    %55 = arith.addf %53, %54 : vector<8x128xf32>
    %cst_20 = arith.constant 0.000000e+00 : f32
    %56 = vector.broadcast %cst_20 : f32 to vector<8x128xf32>
    %57 = arith.maximumf %55, %56 : vector<8x128xf32>
    %c2 = arith.constant 2 : index
    %c0_21 = arith.constant 0 : index
    %c0_22 = arith.constant 0 : index
    %58 = vector.load %arg1[%c2, %c0_21, %c0_22] : memref<5x128x128xf32, #tpu.memory_space<vmem>>, vector<1x128x128xf32>
    %59 = vector.shape_cast %58 : vector<1x128x128xf32> to vector<128x128xf32>
    %cst_23 = arith.constant dense<0.000000e+00> : vector<8x128xf32>
    %60 = tpu.matmul %57, %59, %cst_23 {dimension_numbers = #tpu.dot_dimension_numbers<[1], [0], [0], [1], [0, 0, 1, 1], [], []>} : vector<8x128xf32>, vector<128x128xf32>, vector<8x128xf32> -> vector<8x128xf32>
    %cst_24 = arith.constant dense<0.000000e+00> : vector<128xf32>
    %61 = vector.multi_reduction <add>, %60, %cst_24 [0] : vector<8x128xf32> to vector<128xf32>
    %62 = vector.shape_cast %61 : vector<128xf32> to vector<1x128xf32>
    %cst_25 = arith.constant 8.000000e+00 : f32
    %63 = vector.broadcast %cst_25 : f32 to vector<1x128xf32>
    %64 = arith.divf %62, %63 : vector<1x128xf32>
    %65 = arith.mulf %60, %60 : vector<8x128xf32>
    %cst_26 = arith.constant dense<0.000000e+00> : vector<128xf32>
    %66 = vector.multi_reduction <add>, %65, %cst_26 [0] : vector<8x128xf32> to vector<128xf32>
    %67 = vector.shape_cast %66 : vector<128xf32> to vector<1x128xf32>
    %cst_27 = arith.constant 8.000000e+00 : f32
    %68 = vector.broadcast %cst_27 : f32 to vector<1x128xf32>
    %69 = arith.divf %67, %68 : vector<1x128xf32>
    %70 = arith.mulf %64, %64 : vector<1x128xf32>
    %71 = arith.subf %69, %70 : vector<1x128xf32>
    %cst_28 = arith.constant 1.000000e-03 : f32
    %72 = vector.broadcast %cst_28 : f32 to vector<1x128xf32>
    %73 = arith.addf %71, %72 : vector<1x128xf32>
    %74 = math.rsqrt %73 : vector<1x128xf32>
    %75 = vector.extract_strided_slice %1 {offsets = [2, 0], sizes = [1, 128], strides = [1, 1]} : vector<16x128xf32> to vector<1x128xf32>
    %76 = vector.extract_strided_slice %1 {offsets = [6, 0], sizes = [1, 128], strides = [1, 1]} : vector<16x128xf32> to vector<1x128xf32>
    %77 = vector.broadcast %64 : vector<1x128xf32> to vector<8x128xf32>
    %78 = arith.subf %60, %77 : vector<8x128xf32>
    %79 = arith.mulf %74, %75 : vector<1x128xf32>
    %80 = vector.broadcast %79 : vector<1x128xf32> to vector<8x128xf32>
    %81 = arith.mulf %78, %80 : vector<8x128xf32>
    %82 = vector.broadcast %76 : vector<1x128xf32> to vector<8x128xf32>
    %83 = arith.addf %81, %82 : vector<8x128xf32>
    %cst_29 = arith.constant 0.000000e+00 : f32
    %84 = vector.broadcast %cst_29 : f32 to vector<8x128xf32>
    %85 = arith.maximumf %83, %84 : vector<8x128xf32>
    %c3 = arith.constant 3 : index
    %c0_30 = arith.constant 0 : index
    %c0_31 = arith.constant 0 : index
    %86 = vector.load %arg1[%c3, %c0_30, %c0_31] : memref<5x128x128xf32, #tpu.memory_space<vmem>>, vector<1x128x128xf32>
    %87 = vector.shape_cast %86 : vector<1x128x128xf32> to vector<128x128xf32>
    %cst_32 = arith.constant dense<0.000000e+00> : vector<8x128xf32>
    %88 = tpu.matmul %85, %87, %cst_32 {dimension_numbers = #tpu.dot_dimension_numbers<[1], [0], [0], [1], [0, 0, 1, 1], [], []>} : vector<8x128xf32>, vector<128x128xf32>, vector<8x128xf32> -> vector<8x128xf32>
    %cst_33 = arith.constant dense<0.000000e+00> : vector<128xf32>
    %89 = vector.multi_reduction <add>, %88, %cst_33 [0] : vector<8x128xf32> to vector<128xf32>
    %90 = vector.shape_cast %89 : vector<128xf32> to vector<1x128xf32>
    %cst_34 = arith.constant 8.000000e+00 : f32
    %91 = vector.broadcast %cst_34 : f32 to vector<1x128xf32>
    %92 = arith.divf %90, %91 : vector<1x128xf32>
    %93 = arith.mulf %88, %88 : vector<8x128xf32>
    %cst_35 = arith.constant dense<0.000000e+00> : vector<128xf32>
    %94 = vector.multi_reduction <add>, %93, %cst_35 [0] : vector<8x128xf32> to vector<128xf32>
    %95 = vector.shape_cast %94 : vector<128xf32> to vector<1x128xf32>
    %cst_36 = arith.constant 8.000000e+00 : f32
    %96 = vector.broadcast %cst_36 : f32 to vector<1x128xf32>
    %97 = arith.divf %95, %96 : vector<1x128xf32>
    %98 = arith.mulf %92, %92 : vector<1x128xf32>
    %99 = arith.subf %97, %98 : vector<1x128xf32>
    %cst_37 = arith.constant 1.000000e-03 : f32
    %100 = vector.broadcast %cst_37 : f32 to vector<1x128xf32>
    %101 = arith.addf %99, %100 : vector<1x128xf32>
    %102 = math.rsqrt %101 : vector<1x128xf32>
    %103 = vector.extract_strided_slice %1 {offsets = [3, 0], sizes = [1, 128], strides = [1, 1]} : vector<16x128xf32> to vector<1x128xf32>
    %104 = vector.extract_strided_slice %1 {offsets = [7, 0], sizes = [1, 128], strides = [1, 1]} : vector<16x128xf32> to vector<1x128xf32>
    %105 = vector.broadcast %92 : vector<1x128xf32> to vector<8x128xf32>
    %106 = arith.subf %88, %105 : vector<8x128xf32>
    %107 = arith.mulf %102, %103 : vector<1x128xf32>
    %108 = vector.broadcast %107 : vector<1x128xf32> to vector<8x128xf32>
    %109 = arith.mulf %106, %108 : vector<8x128xf32>
    %110 = vector.broadcast %104 : vector<1x128xf32> to vector<8x128xf32>
    %111 = arith.addf %109, %110 : vector<8x128xf32>
    %cst_38 = arith.constant 0.000000e+00 : f32
    %112 = vector.broadcast %cst_38 : f32 to vector<8x128xf32>
    %113 = arith.maximumf %111, %112 : vector<8x128xf32>
    %c4 = arith.constant 4 : index
    %c0_39 = arith.constant 0 : index
    %c0_40 = arith.constant 0 : index
    %114 = vector.load %arg1[%c4, %c0_39, %c0_40] : memref<5x128x128xf32, #tpu.memory_space<vmem>>, vector<1x128x128xf32>
    %115 = vector.shape_cast %114 : vector<1x128x128xf32> to vector<128x128xf32>
    %cst_41 = arith.constant dense<0.000000e+00> : vector<8x128xf32>
    %116 = tpu.matmul %113, %115, %cst_41 {dimension_numbers = #tpu.dot_dimension_numbers<[1], [0], [0], [1], [0, 0, 1, 1], [], []>} : vector<8x128xf32>, vector<128x128xf32>, vector<8x128xf32> -> vector<8x128xf32>
    %117 = vector.extract_strided_slice %1 {offsets = [8, 0], sizes = [1, 128], strides = [1, 1]} : vector<16x128xf32> to vector<1x128xf32>
    %118 = vector.broadcast %117 : vector<1x128xf32> to vector<8x128xf32>
    %119 = arith.addf %116, %118 : vector<8x128xf32>
    %c0_42 = arith.constant 0 : index
    %c0_43 = arith.constant 0 : index
    %120 = vector.load %arg3[%c0_42, %c0_43] : memref<8x128xf32, #tpu.memory_space<vmem>>, vector<8x128xf32>
    tpu.vector_store %arg3[%c0_42, %c0_43], %119 {strides = array<i32>} : memref<8x128xf32, #tpu.memory_space<vmem>>, vector<8x128xf32>,
    return
  }
}

</mosaic_0001>

<bundles_post_ra>
// kernel: decoder_forward.1
= control target key start
LH: loop header
LB: loop body
LE: loop exit
PB: predicated region body
PF: predicated region fallthrough
CT: control target
= control target key end

     0   :  { %8 = vsyncpa [#allocation3], 0  ;;  %s1192_s0 = inlined_call_operand.vmem [shape: f32[8,128], index: 0, kind: input, shape index: {}]   ;;  %s1193_s1 = inlined_call_operand.hbm [shape: f32[5,128,128], index: 1, kind: input, shape index: {}]   ;;  %s1194_s2 = inlined_call_operand.vmem [shape: f32[16,128], index: 2, kind: input, shape index: {}]   ;;  %s1195_s3 = inlined_call_operand.hbm [shape: f32[8,128], index: 3, kind: output, shape index: {}]  }
   0x1   :  { %9 = vsyncpa [#allocation4], 0  ;;  %s1058_s12 = smov [#allocation2]   ;;  %s1010_s16 = scalar_lea.hbm %s1193_s1, 10240 }
   0x2   :  { %s17_s13 = sshll.u32 %s1058_s12, 4  ;;  %p1011_p0 = scmp.ne.s32.totalorder %s1193_s1, %s1010_s16  ;;  %s18_s13 = int_to_ptr.vmem [resolvable:$true] %s17_s13 }
   0x3   :  { %p1014_p1 = scmp.lt.u32.totalorder %s1010_s16, %s1193_s1 }
   0x5   :  { %p1016_p2 = pnand %p1014_p1, %p1011_p0 }
   0x7   :  { %1019 = shalt.err (!%p1016_p2)
}
   0x8   :  { %s1020_s21 = scalar_lea.vmem %s18_s13, 10240  ;;  %p1025_p4 = scmp.lt.s32.totalorder %s18_s13, %s18_s13 }
   0x9   :  { %p1021_p3 = scmp.ne.s32.totalorder %s18_s13, %s1020_s21  ;;  %p1026_p5 = scmp.lt.s32.totalorder %s1020_s21, %s1020_s21 }
   0xb   :  { %p1027_p6 = por %p1026_p5, %p1025_p4 }
   0xd   :  { %p1028_p7 = pnand %p1027_p6, %p1021_p3 }
   0xf   :  { %1031 = shalt.err (!%p1028_p7)
}
  0x10   :  { %s1059_s22 = smov 128   ;;  %s1060_s23 = smov 8  }
  0x11   :  { %23 = dma.hbm_to_vmem [thread:$0]  %s1193_s1, 10240, %s18_s13, [#allocation3], %s1059_s22, %s1059_s22, %s1060_s23  }
  0x12   :  { %1054 = dma.done.wait [#allocation3], 10240  }
  0x13   :  { %1055 = vsyncadd [#allocation3], 4294957056  ;;  %v1061_v0 = vmov 0.0|0.0   ;;  %vm1062_vm0 = vmmov 0   ;;  %v1063_v1 = vmov 0.0   ;;  %v32_v2 = vld [vmem:[#allocation2] sm:$0xff] }
  0x14   :  { %875 = vmatprep.subr.bf16.mxu0 %v1061_v0  ;;  %732 = vmatprep.mubr.msk.f32.mxu0 %vm1062_vm0, %v1063_v1  ;;  %v33_v3 = vld [vmem:[#allocation2 + $0x8] sm:$0xff]  ;;  %v34_v4 = vld [vmem:[#allocation2 + $0x10] sm:$0xff]  ;;  %v35_v6 = vld [vmem:[#allocation2 + $0x18] sm:$0xff]  ;;  %s1064_s30 = smov [#allocation5]  }
  0x15   :  { %899 = vmatprep.subr.bf16.mxu1 %v1061_v0  ;;  %767 = vmatprep.mubr.msk.f32.mxu1 %vm1062_vm0, %v1063_v1  ;;  %v876_v5 = vpack.c.bf16 %v33_v3, %v32_v2  ;;  %v879_v7 = vpack.c.bf16 %v35_v6, %v34_v4  ;;  %v36_v8 = vld [vmem:[#allocation2 + $0x20] sm:$0xff]  ;;  %v37_v9 = vld [vmem:[#allocation2 + $0x28] sm:$0xff]  ;;  %v38_v11 = vld [vmem:[#allocation2 + $0x30] sm:$0xff]  ;;  %s606_s4 = sshll.u32 %s1064_s30, 4  ;;  %s607_s4 = int_to_ptr.vmem [resolvable:$true] %s606_s4 }
  0x16   :  { %v882_v10 = vpack.c.bf16 %v37_v9, %v36_v8  ;;  %v39_v12 = vld [vmem:[#allocation2 + $0x38] sm:$0xff]  ;;  %v40_v14 = vld [vmem:[#allocation2 + $0x40] sm:$0xff]  ;;  %v41_v15 = vld [vmem:[#allocation2 + $0x48] sm:$0xff]  ;;  %v140_v9 = vlaneseq  ;;  %s1032_s5 = scalar_lea.vmem %s607_s4, 128  ;;  %p1037_p9 = scmp.lt.s32.totalorder %s607_s4, %s607_s4 }
  0x17   :  { %877 = vmatpush3.bf16.msra.mxu0 %v876_v5  ;;  %v885_v13 = vpack.c.bf16 %v39_v12, %v38_v11  ;;  %v888_v16 = vpack.c.bf16 %v41_v15, %v40_v14  ;;  %v42_v17 = vld [vmem:[#allocation2 + $0x50] sm:$0xff]  ;;  %v43_v18 = vld [vmem:[#allocation2 + $0x58] sm:$0xff]  ;;  %v44_v20 = vld [vmem:[#allocation2 + $0x60] sm:$0xff]  ;;  %p1033_p8 = scmp.ne.s32.totalorder %s607_s4, %s1032_s5  ;;  %p1038_p10 = scmp.lt.s32.totalorder %s1032_s5, %s1032_s5 }
  0x18   :  { %878 = vmatprep.subr.bf16.mxu0 %v1061_v0  ;;  %v891_v19 = vpack.c.bf16 %v43_v18, %v42_v17  ;;  %v45_v21 = vld [vmem:[#allocation2 + $0x68] sm:$0xff]  ;;  %v46_v23 = vld [vmem:[#allocation2 + $0x70] sm:$0xff]  ;;  %v47_v24 = vld [vmem:[#allocation2 + $0x78] sm:$0xff] }
  0x19   :  { %v894_v22 = vpack.c.bf16 %v45_v21, %v44_v20  ;;  %v897_v25 = vpack.c.bf16 %v47_v24, %v46_v23  ;;  %v29_v26 = vld [vmem:[%s1192_s0] sm:$0xff]  ;;  %v153_v28 = vld [vmem:[#allocation2 + $0x88] sm:$0xff]  ;;  %v154_v30 = vld [vmem:[#allocation2 + $0x90] sm:$0xff]  ;;  %p1039_p11 = por %p1038_p10, %p1037_p9 }
  0x1a   :  { %v152_v27 = vld [vmem:[#allocation2 + $0x80] sm:$0xff]  ;;  %v155_v31 = vld [vmem:[#allocation2 + $0x98] sm:$0xff]  ;;  %v157_v34 = vld [vmem:[#allocation2 + $0xa8] sm:$0xff] }
  0x1b   :  { %880 = vmatpush3.bf16.msra.mxu0 %v879_v7  ;;  %v900_v29 = vpack.c.bf16 %v153_v28, %v152_v27  ;;  %v903_v32 = vpack.c.bf16 %v155_v31, %v154_v30  ;;  %v156_v33 = vld [vmem:[#allocation2 + $0xa0] sm:$0xff]  ;;  %v158_v36 = vld [vmem:[#allocation2 + $0xb0] sm:$0xff]  ;;  %v159_v37 = vld [vmem:[#allocation2 + $0xb8] sm:$0xff]  ;;  %p1040_p12 = pnand %p1039_p11, %p1033_p8 }
  0x1c   :  { %881 = vmatprep.subr.bf16.mxu0 %v1061_v0  ;;  %v906_v35 = vpack.c.bf16 %v157_v34, %v156_v33  ;;  %v909_v38 = vpack.c.bf16 %v159_v37, %v158_v36  ;;  %v160_v39 = vld [vmem:[#allocation2 + $0xc0] sm:$0xff]  ;;  %v161_v40 = vld [vmem:[#allocation2 + $0xc8] sm:$0xff]  ;;  %v162_v42 = vld [vmem:[#allocation2 + $0xd0] sm:$0xff] }
  0x1d   :  { %901 = vmatpush3.bf16.msra.mxu1 %v900_v29  ;;  %v912_v41 = vpack.c.bf16 %v161_v40, %v160_v39  ;;  %v163_v43 = vld [vmem:[#allocation2 + $0xd8] sm:$0xff]  ;;  %v164_v45 = vld [vmem:[#allocation2 + $0xe0] sm:$0xff]  ;;  %v165_v46 = vld [vmem:[#allocation2 + $0xe8] sm:$0xff] }
  0x1e   :  { %902 = vmatprep.subr.bf16.mxu1 %v1061_v0  ;;  %v915_v44 = vpack.c.bf16 %v163_v43, %v162_v42  ;;  %v918_v47 = vpack.c.bf16 %v165_v46, %v164_v45  ;;  %v166_v48 = vld [vmem:[#allocation2 + $0xf0] sm:$0xff]  ;;  %v167_v49 = vld [vmem:[#allocation2 + $0xf8] sm:$0xff]  ;;  %v1129_v11 = vld [vmem:[%s1194_s2] sm:$0xff] }
  0x1f   :  { %883 = vmatpush3.bf16.msra.mxu0 %v882_v10  ;;  %v921_v50 = vpack.c.bf16 %v167_v49, %v166_v48  ;;  %v1124_v10 = vshrl.u32 %v140_v9, 7  ;;  %v272_v23 = vld [vmem:[#allocation2 + $0x108] sm:$0xff]  ;;  %v275_v28 = vld [vmem:[#allocation2 + $0x120] sm:$0xff]  ;;  %v277_v31 = vld [vmem:[#allocation2 + $0x130] sm:$0xff] }
  0x20   :  { %884 = vmatprep.subr.bf16.mxu0 %v1061_v0  ;;  %v276_v29 = vld [vmem:[#allocation2 + $0x128] sm:$0xff]  ;;  %v279_v34 = vld [vmem:[#allocation2 + $0x140] sm:$0xff]  ;;  %v281_v37 = vld [vmem:[#allocation2 + $0x150] sm:$0xff] }
  0x21   :  { %904 = vmatpush3.bf16.msra.mxu1 %v903_v32  ;;  %v142_v12 = vsub.s32 0, %v1124_v10  ;;  %v930_v30 = vpack.c.bf16 %v276_v29, %v275_v28  ;;  %v278_v32 = vld [vmem:[#allocation2 + $0x138] sm:$0xff]  ;;  %v283_v40 = vld [vmem:[#allocation2 + $0x160] sm:$0xff]  ;;  %v285_v43 = vld [vmem:[#allocation2 + $0x170] sm:$0xff] }
  0x22   :  { %905 = vmatprep.subr.bf16.mxu1 %v1061_v0  ;;  %v933_v33 = vpack.c.bf16 %v278_v32, %v277_v31  ;;  %v398_v28 = vld [vmem:[#allocation2 + $0x1c0] sm:$0xff]  ;;  %v399_v29 = vld [vmem:[#allocation2 + $0x1c8] sm:$0xff]  ;;  %v400_v31 = vld [vmem:[#allocation2 + $0x1d0] sm:$0xff] }
  0x23   :  { %886 = vmatpush3.bf16.msra.mxu0 %v885_v13  ;;  %v147_v13 = vsub.s32 4, %v1124_v10  ;;  %v401_v32 = vld [vmem:[#allocation2 + $0x1d8] sm:$0xff] }
  0x24   :  { %887 = vmatprep.subr.bf16.mxu0 %v1061_v0 }
  0x25   :  { %907 = vmatpush3.bf16.msra.mxu1 %v906_v35  ;;  %v148_v18 = vrot.slane %v1129_v11, %v147_v13  ;;  %v280_v35 = vld [vmem:[#allocation2 + $0x148] sm:$0xff] }
  0x26   :  { %908 = vmatprep.subr.bf16.mxu1 %v1061_v0  ;;  %v936_v36 = vpack.c.bf16 %v280_v35, %v279_v34  ;;  %v402_v34 = vld [vmem:[#allocation2 + $0x1e0] sm:$0xff]  ;;  %v403_v35 = vld [vmem:[#allocation2 + $0x1e8] sm:$0xff] }
  0x27   :  { %889 = vmatpush3.bf16.msra.mxu0 %v888_v16 }
  0x28   :  { %890 = vmatprep.subr.bf16.mxu0 %v1061_v0 }
  0x29   :  { %910 = vmatpush3.bf16.msra.mxu1 %v909_v38  ;;  %v282_v38 = vld [vmem:[#allocation2 + $0x158] sm:$0xff] }
  0x2a   :  { %911 = vmatprep.subr.bf16.mxu1 %v1061_v0  ;;  %v939_v39 = vpack.c.bf16 %v282_v38, %v281_v37  ;;  %v404_v37 = vld [vmem:[#allocation2 + $0x1f0] sm:$0xff]  ;;  %v405_v38 = vld [vmem:[#allocation2 + $0x1f8] sm:$0xff] }
  0x2b   :  { %892 = vmatpush3.bf16.msra.mxu0 %v891_v19 }
  0x2c   :  { %893 = vmatprep.subr.bf16.mxu0 %v1061_v0 }
  0x2d   :  { %913 = vmatpush3.bf16.msra.mxu1 %v912_v41  ;;  %v284_v41 = vld [vmem:[#allocation2 + $0x168] sm:$0xff] }
  0x2e   :  { %914 = vmatprep.subr.bf16.mxu1 %v1061_v0  ;;  %v942_v42 = vpack.c.bf16 %v284_v41, %v283_v40 }
  0x2f   :  { %895 = vmatpush3.bf16.msra.mxu0 %v894_v22  ;;  %v271_v22 = vld [vmem:[#allocation2 + $0x100] sm:$0xff] }
  0x30   :  { %896 = vmatprep.subr.bf16.mxu0 %v1061_v0  ;;  %v924_v24 = vpack.c.bf16 %v272_v23, %v271_v22  ;;  %v394_v23 = vld [vmem:[#allocation2 + $0x1a0] sm:$0xff] }
  0x31   :  { %916 = vmatpush3.bf16.msra.mxu1 %v915_v44  ;;  %v286_v44 = vld [vmem:[#allocation2 + $0x178] sm:$0xff] }
  0x32   :  { %917 = vmatprep.subr.bf16.mxu1 %v1061_v0  ;;  %v945_v45 = vpack.c.bf16 %v286_v44, %v285_v43 }
  0x33   :  { %898 = vmatpush3.bf16.msra.mxu0 %v897_v25  ;;  %v273_v25 = vld [vmem:[#allocation2 + $0x110] sm:$0xff] }
  0x34   :  { %923 = vmatprep.subr.bf16.mxu0 %v1061_v0 }
  0x35   :  { %919 = vmatpush3.bf16.msra.mxu1 %v918_v47 }
  0x36   :  { %733 = vmatmul.mubr.f32.vlgmr.msra.gmra.mrb[0].mxu0 %v29_v26  ;;  %920 = vmatprep.subr.bf16.mxu1 %v1061_v0  ;;  %v274_v26 = vld [vmem:[#allocation2 + $0x118] sm:$0xff] }
  0x37   :  { %802 = vmatprep.mubr.msk.f32.mxu0 %vm1062_vm0, %v1063_v1  ;;  %925 = vmatpush3.bf16.msra.mxu0 %v924_v24  ;;  %v927_v27 = vpack.c.bf16 %v274_v26, %v273_v25  ;;  %v395_v24 = vld [vmem:[#allocation2 + $0x1a8] sm:$0xff]  ;;  %v396_v26 = vld [vmem:[#allocation2 + $0x1b0] sm:$0xff] }
  0x38   :  { %926 = vmatprep.subr.bf16.mxu0 %v1061_v0  ;;  %v954_v25 = vpack.c.bf16 %v395_v24, %v394_v23  ;;  %v517_v23 = vld [vmem:[#allocation2 + $0x240] sm:$0xff]  ;;  %v518_v24 = vld [vmem:[#allocation2 + $0x248] sm:$0xff] }
  0x39   :  { %922 = vmatpush3.bf16.msra.mxu1 %v921_v50 }
  0x3a   :  { %947 = vmatprep.subr.bf16.mxu1 %v1061_v0 }
  0x3b   :  { %928 = vmatpush3.bf16.msra.mxu0 %v927_v27 }
  0x3c   :  { %929 = vmatprep.subr.bf16.mxu0 %v1061_v0 }
  0x3f   :  { %931 = vmatpush3.bf16.msra.mxu0 %v930_v30  ;;  %v960_v30 = vpack.c.bf16 %v399_v29, %v398_v28  ;;  %v521_v28 = vld [vmem:[#allocation2 + $0x260] sm:$0xff]  ;;  %v522_v29 = vld [vmem:[#allocation2 + $0x268] sm:$0xff] }
  0x40   :  { %932 = vmatprep.subr.bf16.mxu0 %v1061_v0 }
  0x43   :  { %934 = vmatpush3.bf16.msra.mxu0 %v933_v33  ;;  %v963_v33 = vpack.c.bf16 %v401_v32, %v400_v31  ;;  %v523_v31 = vld [vmem:[#allocation2 + $0x270] sm:$0xff]  ;;  %v524_v32 = vld [vmem:[#allocation2 + $0x278] sm:$0xff] }
  0x44   :  { %935 = vmatprep.subr.bf16.mxu0 %v1061_v0 }
  0x47   :  { %937 = vmatpush3.bf16.msra.mxu0 %v936_v36  ;;  %v966_v36 = vpack.c.bf16 %v403_v35, %v402_v34 }
  0x48   :  { %938 = vmatprep.subr.bf16.mxu0 %v1061_v0 }
  0x4b   :  { %940 = vmatpush3.bf16.msra.mxu0 %v939_v39  ;;  %v969_v39 = vpack.c.bf16 %v405_v38, %v404_v37 }
  0x4c   :  { %941 = vmatprep.subr.bf16.mxu0 %v1061_v0 }
  0x4f   :  { %943 = vmatpush3.bf16.msra.mxu0 %v942_v42 }
  0x50   :  { %944 = vmatprep.subr.bf16.mxu0 %v1061_v0 }
  0x53   :  { %946 = vmatpush3.bf16.msra.mxu0 %v945_v45 }
  0x54   :  { %971 = vmatprep.subr.bf16.mxu0 %v1061_v0 }
 0x109   :  { %v114_v51 = vpop.f32.mrb[0].mxu0 }
 0x10a   :  { %v118_v52 = vrot.slane %v114_v51, 4  ;;  %v126_v53 = vmul.f32 %v114_v51, %v114_v51  ;;  %v734_v54 = vpop.f32.mrb[1].mxu0 }
 0x10c   :  { %v119_v55 = vadd.f32 %v118_v52, %v114_v51  ;;  %v127_v56 = vrot.slane %v126_v53, 4 }
 0x10e   :  { %v120_v57 = vrot.slane %v119_v55, 2  ;;  %v128_v58 = vadd.f32 %v127_v56, %v126_v53 }
 0x110   :  { %v121_v59 = vadd.f32 %v120_v57, %v119_v55  ;;  %v129_v60 = vrot.slane %v128_v58, 2 }
 0x112   :  { %v122_v61 = vrot.slane %v121_v59, 1  ;;  %v130_v62 = vadd.f32 %v129_v60, %v128_v58 }
 0x114   :  { %v123_v63 = vadd.f32 %v122_v61, %v121_v59  ;;  %v131_v2 = vrot.slane %v130_v62, 1 }
 0x116   :  { %v125_v3 = vmul.f32 0.125, %v123_v63  ;;  %v132_v4 = vadd.f32 %v131_v2, %v130_v62 }
 0x118   :  { %v133_v5 = vmul.f32 0.125, %v132_v4  ;;  %v134_v6 = vmul.f32 %v125_v3, %v125_v3  ;;  %v138_v16 = vsub.f32 %v114_v51, %v125_v3  ;;  %v261_v4 = vsub.s32 1, %v1124_v10 }
 0x11a   :  { %v135_v7 = vsub.f32 %v133_v5, %v134_v6  ;;  %v266_v5 = vsub.s32 5, %v1124_v10 }
 0x11c   :  { %v136_v8 = vadd.f32 0.001, %v135_v7  ;;  %v267_v13 = vrot.slane %v1129_v11, %v266_v5 }
 0x11e   :  { %1002 = vrsqrt.f32 %v136_v8 }
 0x128   :  { %v1003_v14 = vpop.eup %1002 }
 0x129   :  { %v139_v15 = vmul.f32 %v1003_v14, %v1129_v11 }
 0x12b   :  { %v143_v17 = vrot.slane %v139_v15, %v142_v12 }
 0x12d   :  { %v144_v19 = vmul.f32 %v143_v17, %v138_v16  ;;  %v390_v17 = vld [vmem:[#allocation2 + $0x180] sm:$0xff] }
 0x12f   :  { %v149_v20 = vadd.f32 %v148_v18, %v144_v19  ;;  %v391_v18 = vld [vmem:[#allocation2 + $0x188] sm:$0xff] }
 0x130   :  { %v948_v19 = vpack.c.bf16 %v391_v18, %v390_v17  ;;  %v513_v17 = vld [vmem:[#allocation2 + $0x220] sm:$0xff]  ;;  %v514_v18 = vld [vmem:[#allocation2 + $0x228] sm:$0xff] }
 0x131   :  { %v150_v21 = vmax.f32 %v149_v20, 0.0  ;;  %v392_v20 = vld [vmem:[#allocation2 + $0x190] sm:$0xff] }
 0x133   :  { %768 = vmatmul.mubr.f32.vlgmr.msra.gmra.mrb[0].mxu1 %v150_v21  ;;  %v393_v21 = vld [vmem:[#allocation2 + $0x198] sm:$0xff] }
 0x134   :  { %837 = vmatprep.mubr.msk.f32.mxu1 %vm1062_vm0, %v1063_v1  ;;  %949 = vmatpush3.bf16.msra.mxu1 %v948_v19  ;;  %v951_v22 = vpack.c.bf16 %v393_v21, %v392_v20  ;;  %v978_v19 = vpack.c.bf16 %v514_v18, %v513_v17  ;;  %v515_v20 = vld [vmem:[#allocation2 + $0x230] sm:$0xff]  ;;  %v516_v21 = vld [vmem:[#allocation2 + $0x238] sm:$0xff] }
 0x135   :  { %950 = vmatprep.subr.bf16.mxu1 %v1061_v0 }
 0x138   :  { %952 = vmatpush3.bf16.msra.mxu1 %v951_v22  ;;  %v981_v22 = vpack.c.bf16 %v516_v21, %v515_v20 }
 0x139   :  { %953 = vmatprep.subr.bf16.mxu1 %v1061_v0 }
 0x13c   :  { %955 = vmatpush3.bf16.msra.mxu1 %v954_v25  ;;  %v984_v25 = vpack.c.bf16 %v518_v24, %v517_v23 }
 0x13d   :  { %956 = vmatprep.subr.bf16.mxu1 %v1061_v0 }
 0x206   :  { %v234_v46 = vpop.f32.mrb[0].mxu1 }
 0x207   :  { %v238_v47 = vrot.slane %v234_v46, 4  ;;  %v245_v48 = vmul.f32 %v234_v46, %v234_v46  ;;  %v769_v49 = vpop.f32.mrb[1].mxu1 }
 0x209   :  { %v239_v50 = vadd.f32 %v238_v47, %v234_v46  ;;  %v246_v51 = vrot.slane %v245_v48, 4 }
 0x20b   :  { %v240_v52 = vrot.slane %v239_v50, 2  ;;  %v247_v53 = vadd.f32 %v246_v51, %v245_v48 }
 0x20d   :  { %v241_v54 = vadd.f32 %v240_v52, %v239_v50  ;;  %v248_v55 = vrot.slane %v247_v53, 2 }
 0x20f   :  { %v242_v56 = vrot.slane %v241_v54, 1  ;;  %v249_v57 = vadd.f32 %v248_v55, %v247_v53 }
 0x211   :  { %v243_v58 = vadd.f32 %v242_v56, %v241_v54  ;;  %v250_v59 = vrot.slane %v249_v57, 1 }
 0x213   :  { %v244_v60 = vmul.f32 0.125, %v243_v58  ;;  %v251_v61 = vadd.f32 %v250_v59, %v249_v57 }
 0x215   :  { %v252_v62 = vmul.f32 0.125, %v251_v61  ;;  %v253_v63 = vmul.f32 %v244_v60, %v244_v60  ;;  %v257_v8 = vsub.f32 %v234_v46, %v244_v60  ;;  %v380_v60 = vsub.s32 2, %v1124_v10 }
 0x216   :  { %v385_v61 = vsub.s32 6, %v1124_v10 }
 0x217   :  { %v254_v2 = vsub.f32 %v252_v62, %v253_v63 }
 0x219   :  { %v255_v3 = vadd.f32 0.001, %v254_v2 }
 0x21b   :  { %1004 = vrsqrt.f32 %v255_v3 }
 0x225   :  { %v1005_v6 = vpop.eup %1004 }
 0x226   :  { %v258_v7 = vmul.f32 %v1005_v6, %v1129_v11 }
 0x228   :  { %v262_v9 = vrot.slane %v258_v7, %v261_v4  ;;  %v386_v4 = vrot.slane %v1129_v11, %v385_v61 }
 0x22a   :  { %v263_v14 = vmul.f32 %v262_v9, %v257_v8  ;;  %v509_v8 = vld [vmem:[#allocation2 + $0x200] sm:$0xff]  ;;  %v510_v9 = vld [vmem:[#allocation2 + $0x208] sm:$0xff] }
 0x22c   :  { %v268_v15 = vadd.f32 %v267_v13, %v263_v14  ;;  %v972_v13 = vpack.c.bf16 %v510_v9, %v509_v8  ;;  %v511_v14 = vld [vmem:[#allocation2 + $0x210] sm:$0xff] }
 0x22e   :  { %v269_v16 = vmax.f32 %v268_v15, 0.0  ;;  %v512_v15 = vld [vmem:[#allocation2 + $0x218] sm:$0xff] }
 0x230   :  { %803 = vmatmul.mubr.f32.vlgmr.msra.gmra.mrb[2].mxu0 %v269_v16  ;;  %v975_v16 = vpack.c.bf16 %v512_v15, %v511_v14 }
 0x231   :  { %872 = vmatprep.mubr.msk.f32.mxu0 %vm1062_vm0, %v1063_v1  ;;  %v397_v1 = vld [vmem:[#allocation2 + $0x1b8] sm:$0xff]  ;;  %973 = vmatpush3.bf16.msra.mxu0 %v972_v13 }
 0x232   :  { %v957_v27 = vpack.c.bf16 %v397_v1, %v396_v26  ;;  %974 = vmatprep.subr.bf16.mxu0 %v1061_v0  ;;  %v519_v26 = vld [vmem:[#allocation2 + $0x250] sm:$0xff]  ;;  %v520_v1 = vld [vmem:[#allocation2 + $0x258] sm:$0xff] }
 0x234   :  { %958 = vmatpush3.bf16.msra.mxu1 %v957_v27  ;;  %v987_v27 = vpack.c.bf16 %v520_v1, %v519_v26 }
 0x235   :  { %959 = vmatprep.subr.bf16.mxu1 %v1061_v0  ;;  %976 = vmatpush3.bf16.msra.mxu0 %v975_v16 }
 0x236   :  { %977 = vmatprep.subr.bf16.mxu0 %v1061_v0 }
 0x238   :  { %961 = vmatpush3.bf16.msra.mxu1 %v960_v30  ;;  %v990_v30 = vpack.c.bf16 %v522_v29, %v521_v28 }
 0x239   :  { %962 = vmatprep.subr.bf16.mxu1 %v1061_v0  ;;  %979 = vmatpush3.bf16.msra.mxu0 %v978_v19 }
 0x23a   :  { %980 = vmatprep.subr.bf16.mxu0 %v1061_v0 }
 0x23c   :  { %964 = vmatpush3.bf16.msra.mxu1 %v963_v33  ;;  %v993_v33 = vpack.c.bf16 %v524_v32, %v523_v31 }
 0x23d   :  { %965 = vmatprep.subr.bf16.mxu1 %v1061_v0  ;;  %982 = vmatpush3.bf16.msra.mxu0 %v981_v22 }
 0x23e   :  { %983 = vmatprep.subr.bf16.mxu0 %v1061_v0 }
 0x240   :  { %967 = vmatpush3.bf16.msra.mxu1 %v966_v36 }
 0x241   :  { %968 = vmatprep.subr.bf16.mxu1 %v1061_v0  ;;  %985 = vmatpush3.bf16.msra.mxu0 %v984_v25 }
 0x242   :  { %986 = vmatprep.subr.bf16.mxu0 %v1061_v0 }
 0x244   :  { %970 = vmatpush3.bf16.msra.mxu1 %v969_v39 }
 0x245   :  { %988 = vmatpush3.bf16.msra.mxu0 %v987_v27 }
 0x246   :  { %989 = vmatprep.subr.bf16.mxu0 %v1061_v0 }
 0x249   :  { %991 = vmatpush3.bf16.msra.mxu0 %v990_v30 }
 0x24a   :  { %992 = vmatprep.subr.bf16.mxu0 %v1061_v0 }
 0x24d   :  { %994 = vmatpush3.bf16.msra.mxu0 %v993_v33 }
 0x303   :  { %v353_v40 = vpop.f32.mrb[2].mxu0 }
 0x304   :  { %v357_v41 = vrot.slane %v353_v40, 4  ;;  %v364_v42 = vmul.f32 %v353_v40, %v353_v40  ;;  %v804_v43 = vpop.f32.mrb[3].mxu0 }
 0x306   :  { %v358_v44 = vadd.f32 %v357_v41, %v353_v40  ;;  %v365_v45 = vrot.slane %v364_v42, 4 }
 0x308   :  { %v359_v46 = vrot.slane %v358_v44, 2  ;;  %v366_v47 = vadd.f32 %v365_v45, %v364_v42 }
 0x30a   :  { %v360_v48 = vadd.f32 %v359_v46, %v358_v44  ;;  %v367_v49 = vrot.slane %v366_v47, 2 }
 0x30c   :  { %v361_v50 = vrot.slane %v360_v48, 1  ;;  %v368_v51 = vadd.f32 %v367_v49, %v366_v47 }
 0x30e   :  { %v362_v52 = vadd.f32 %v361_v50, %v360_v48  ;;  %v369_v53 = vrot.slane %v368_v51, 1 }
 0x310   :  { %v363_v54 = vmul.f32 0.125, %v362_v52  ;;  %v370_v55 = vadd.f32 %v369_v53, %v368_v51  ;;  %v499_v53 = vsub.s32 3, %v1124_v10 }
 0x312   :  { %v371_v56 = vmul.f32 0.125, %v370_v55  ;;  %v372_v57 = vmul.f32 %v363_v54, %v363_v54  ;;  %v376_v2 = vsub.f32 %v353_v40, %v363_v54  ;;  %v504_v54 = vsub.s32 7, %v1124_v10 }
 0x314   :  { %v373_v58 = vsub.f32 %v371_v56, %v372_v57 }
 0x316   :  { %v374_v59 = vadd.f32 0.001, %v373_v58 }
 0x318   :  { %1006 = vrsqrt.f32 %v374_v59  ;;  %v505_v59 = vrot.slane %v1129_v11, %v504_v54 }
 0x322   :  { %v1007_v62 = vpop.eup %1006 }
 0x323   :  { %v377_v63 = vmul.f32 %v1007_v62, %v1129_v11 }
 0x325   :  { %v381_v3 = vrot.slane %v377_v63, %v380_v60  ;;  %v31_v63 = vld [vmem:[%s1194_s2 + $0x8] sm:$0xff] }
 0x327   :  { %v382_v5 = vmul.f32 %v381_v3, %v376_v2  ;;  %v528_v2 = vrot.slane %v31_v63, %v142_v12 }
 0x329   :  { %v387_v6 = vadd.f32 %v386_v4, %v382_v5 }
 0x32b   :  { %v388_v7 = vmax.f32 %v387_v6, 0.0 }
 0x32d   :  { %838 = vmatmul.mubr.f32.vlgmr.msra.gmra.mrb[2].mxu1 %v388_v7 }
 0x400   :  { %v472_v34 = vpop.f32.mrb[2].mxu1 }
 0x401   :  { %v476_v35 = vrot.slane %v472_v34, 4  ;;  %v483_v36 = vmul.f32 %v472_v34, %v472_v34  ;;  %v839_v37 = vpop.f32.mrb[3].mxu1 }
 0x403   :  { %v477_v38 = vadd.f32 %v476_v35, %v472_v34  ;;  %v484_v39 = vrot.slane %v483_v36, 4 }
 0x405   :  { %v478_v40 = vrot.slane %v477_v38, 2  ;;  %v485_v41 = vadd.f32 %v484_v39, %v483_v36 }
 0x407   :  { %v479_v42 = vadd.f32 %v478_v40, %v477_v38  ;;  %v486_v43 = vrot.slane %v485_v41, 2 }
 0x409   :  { %v480_v44 = vrot.slane %v479_v42, 1  ;;  %v487_v45 = vadd.f32 %v486_v43, %v485_v41 }
 0x40b   :  { %v481_v46 = vadd.f32 %v480_v44, %v479_v42  ;;  %v488_v47 = vrot.slane %v487_v45, 1 }
 0x40d   :  { %v482_v48 = vmul.f32 0.125, %v481_v46  ;;  %v489_v0 = vadd.f32 %v488_v47, %v487_v45 }
 0x40f   :  { %v490_v49 = vmul.f32 0.125, %v489_v0  ;;  %v491_v50 = vmul.f32 %v482_v48, %v482_v48  ;;  %v495_v57 = vsub.f32 %v472_v34, %v482_v48 }
 0x411   :  { %v492_v51 = vsub.f32 %v490_v49, %v491_v50 }
 0x413   :  { %v493_v52 = vadd.f32 0.001, %v492_v51 }
 0x415   :  { %1008 = vrsqrt.f32 %v493_v52 }
 0x41f   :  { %v1009_v55 = vpop.eup %1008 }
 0x420   :  { %v496_v56 = vmul.f32 %v1009_v55, %v1129_v11 }
 0x422   :  { %v500_v58 = vrot.slane %v496_v56, %v499_v53 }
 0x424   :  { %v501_v60 = vmul.f32 %v500_v58, %v495_v57 }
 0x426   :  { %v506_v61 = vadd.f32 %v505_v59, %v501_v60 }
 0x428   :  { %v507_v62 = vmax.f32 %v506_v61, 0.0 }
 0x42a   :  { %873 = vmatmul.mubr.f32.vlgmr.msra.gmra.mrb[4].mxu0 %v507_v62 }
 0x4fd   :  { %v595_v3 = vpop.f32.mrb[4].mxu0 }
 0x4fe   :  { %v596_v4 = vadd.f32 %v595_v3, %v528_v2  ;;  %v874_v5 = vpop.f32.mrb[5].mxu0 }
 0x500   :  { %599 = vst [vmem:[#allocation5] sm:$0xff] %v596_v4 }
 0x501   :  { %1043 = shalt.err (!%p1040_p12)
}
 0x502   :  { %s1044_s2 = scalar_lea.hbm %s1195_s3, 128 }
 0x503   :  { %p1045_p13 = scmp.ne.s32.totalorder %s1195_s3, %s1044_s2  ;;  %p1048_p0 = scmp.lt.u32.totalorder %s1044_s2, %s1195_s3 }
 0x505   :  { %p1050_p1 = pnand %p1048_p0, %p1045_p13 }
 0x507   :  { %1053 = shalt.err (!%p1050_p1)
}
 0x508   :  { %609 = dma.vmem_to_hbm [thread:$0]  %s607_s4, 128, %s1195_s3, [#allocation4]  }
 0x509   :  { %1056 = dma.done.wait [#allocation4], 128  }
 0x50a   :  { %1057 = vsyncadd [#allocation4], 4294967168 }
 0x50b   :  { %613 = vsyncpa [#allocation3], 1 }
 0x50c   :  { %614 = vsyncpa [#allocation4], 1 }

</bundles_post_ra>
